<compile_context>
chip_gen: v6e
topology: v6e:2x2x1
jax: 0.10.0
libtpu: 0.0.40
codegen_flags: <defaults>
</compile_context>

<pallas_src>
import math
import functools

import jax
import jax.numpy as jnp
from jax.experimental import pallas as pl
from jax.experimental.pallas import tpu as pltpu


_VMEM_LIMIT = 32 * 1024 * 1024   # safe on v5e/v6e/v7x scoped-VMEM budgets


# -----------------------------------------------------------------------------
# Tiling helpers
# -----------------------------------------------------------------------------

def _round_up(x, m):
    return (x + m - 1) // m * m


def _choose_tk(K):
    """Single full-K reduction step when small enough; else the largest
    128-multiple divisor of K that is <= 2048 (e.g. 5760 -> 1920, 3 steps)."""
    if K <= 4096:
        return K
    for tk in range(2048, 0, -128):
        if K % tk == 0:
            return tk
    return K


def _choose_tm(Mp, tk):
    """Cover all of M in one tile when the bf16 A block stays under ~8 MiB
    (so the weight matrix is streamed exactly once)."""
    budget = 8 * 1024 * 1024
    if Mp * tk * 2 <= budget:
        return Mp
    for t in (2048, 1024, 512, 256, 128, 64, 32, 16):
        if Mp % t == 0 and t * tk * 2 <= budget:
            return t
    return Mp


# -----------------------------------------------------------------------------
# Pallas kernels
# -----------------------------------------------------------------------------

@functools.lru_cache(maxsize=None)
def _make_matmul_kernel(has_scale, has_shift, has_res, res_first, relu, l2norm,
                        single_k):
    """Tiled MXU matmul with a fused epilogue (BN scale/shift, residual add either
    before or after the BN, ReLU, L2-normalize).  single_k skips the accumulator."""

    def epilogue(y, s_ref, t_ref, r_ref):
        if has_res and res_first:
            y = y + r_ref[...].astype(jnp.float32)
        if has_scale:
            y = y * s_ref[...]
        if has_shift:
            y = y + t_ref[...]
        if has_res and not res_first:
            y = y + r_ref[...].astype(jnp.float32)
        if relu:
            y = jnp.maximum(y, 0.0)
        if l2norm:
            nrm = jnp.sqrt(jnp.sum(y * y, axis=-1, keepdims=True))
            y = y / jnp.maximum(nrm, 1e-12)     # F.normalize(dim=1) semantics
        return y

    def kernel(*refs):
        refs = list(refs)
        a_ref = refs.pop(0)
        b_ref = refs.pop(0)
        s_ref = refs.pop(0) if has_scale else None
        t_ref = refs.pop(0) if has_shift else None
        r_ref = refs.pop(0) if has_res else None

        if single_k:
            (o_ref,) = refs
            y = jnp.dot(a_ref[...], b_ref[...],
                        preferred_element_type=jnp.float32)
            o_ref[...] = epilogue(y, s_ref, t_ref, r_ref).astype(o_ref.dtype)
        else:
            o_ref, acc_ref = refs

            @pl.when(pl.program_id(2) == 0)
            def _init():
                acc_ref[...] = jnp.zeros_like(acc_ref)

            acc_ref[...] += jnp.dot(a_ref[...], b_ref[...],
                                    preferred_element_type=jnp.float32)

            @pl.when(pl.program_id(2) == pl.num_programs(2) - 1)
            def _finalize():
                o_ref[...] = epilogue(acc_ref[...], s_ref, t_ref,
                                      r_ref).astype(o_ref.dtype)

    return kernel


def _scale_shift_relu_kernel(x_ref, s_ref, b_ref, o_ref):
    x = x_ref[...].astype(jnp.float32)
    o_ref[...] = jnp.maximum(x * s_ref[...] + b_ref[...], 0.0).astype(o_ref.dtype)


def _bn_relu_pool_kernel(x_ref, s_ref, b_ref, o_ref):
    x = x_ref[...].astype(jnp.float32)                     # (TB, HW, C)
    y = jnp.maximum(x * s_ref[...] + b_ref[...], 0.0)
    o_ref[...] = jnp.mean(y, axis=1, keepdims=True).astype(o_ref.dtype)


# -----------------------------------------------------------------------------
# Pallas wrappers
# -----------------------------------------------------------------------------

def _matmul_call(a, w, k_pad, n_out, scale, shift, residual, res_first, relu,
                 l2norm, out_dtype):
    """a: (M, K) ; w: (k_pad, n_out) bf16 pre-padded weight.  Returns (M, n_out)."""
    M, K = a.shape
    Kp, N = w.shape
    assert Kp == k_pad and N == n_out and Kp >= K

    # bf16 packs (16,128) vregs -> pad M to a multiple of 16 (only the tiny head
    # GEMMs actually pad; conv GEMMs have M = batch * Ho * Wo, a multiple of 16).
    Mp = max(16, _round_up(M, 16))
    a_p = a.astype(jnp.bfloat16)
    if (Mp, Kp) != (M, K):
        a_p = jnp.pad(a_p, ((0, Mp - M), (0, Kp - K)))

    tk = _choose_tk(Kp)
    n_k = Kp // tk
    tm = _choose_tm(Mp, tk)
    single_k = (n_k == 1)

    inputs = [a_p, w]
    in_specs = [pl.BlockSpec((tm, tk), lambda i, j, k: (i, k)),
                pl.BlockSpec((tk, N), lambda i, j, k: (k, j))]
    vec_spec = pl.BlockSpec((1, N), lambda i, j, k: (0, j))
    if scale is not None:
        inputs.append(scale.reshape(1, N).astype(jnp.float32))
        in_specs.append(vec_spec)
    if shift is not None:
        inputs.append(shift.reshape(1, N).astype(jnp.float32))
        in_specs.append(vec_spec)
    if residual is not None:
        r = residual.astype(jnp.bfloat16)
        if r.shape[0] != Mp:
            r = jnp.pad(r, ((0, Mp - r.shape[0]), (0, 0)))
        inputs.append(r)
        in_specs.append(pl.BlockSpec((tm, N), lambda i, j, k: (i, j)))

    kernel = _make_matmul_kernel(scale is not None, shift is not None,
                                 residual is not None, res_first, relu, l2norm,
                                 single_k)

    out = pl.pallas_call(
        kernel,
        out_shape=jax.ShapeDtypeStruct((Mp, N), out_dtype),
        grid_spec=pltpu.PrefetchScalarGridSpec(
            num_scalar_prefetch=0,
            grid=(Mp // tm, 1, n_k),
            in_specs=in_specs,
            out_specs=pl.BlockSpec((tm, N), lambda i, j, k: (i, j)),
            scratch_shapes=([] if single_k
                            else [pltpu.VMEM((tm, N), jnp.float32)]),
        ),
        compiler_params=pltpu.CompilerParams(
            dimension_semantics=("parallel", "parallel", "arbitrary"),
            vmem_limit_bytes=_VMEM_LIMIT),
    )(*inputs)

    if Mp != M:
        out = out[:M]
    return out


def pallas_matmul(a, wp, *, scale=None, shift=None, residual=None,
                  res_first=False, relu=False, l2norm=False,
                  out_dtype=jnp.bfloat16):
    return _matmul_call(a, wp['w'], wp['kpad'], wp['cout'], scale, shift,
                        residual, res_first, relu, l2norm, out_dtype)


def pallas_scale_shift_relu(x2d, scale, shift, out_dtype=jnp.bfloat16):
    """relu(x * scale + shift) row-wise (folded BN + ReLU)."""
    M, C = x2d.shape
    tm = M
    if M % 8 == 0 and M * C * 4 > (4 << 20):      # tile only if the block is big
        for t in (1024, 512, 256, 128, 64, 32, 16, 8):
            if M % t == 0 and t * C * 4 <= (4 << 20):
                tm = t
                break
    return pl.pallas_call(
        _scale_shift_relu_kernel,
        out_shape=jax.ShapeDtypeStruct((M, C), out_dtype),
        grid=(M // tm,),
        in_specs=[pl.BlockSpec((tm, C), lambda i: (i, 0)),
                  pl.BlockSpec((1, C), lambda i: (0, 0)),
                  pl.BlockSpec((1, C), lambda i: (0, 0))],
        out_specs=pl.BlockSpec((tm, C), lambda i: (i, 0)),
        compiler_params=pltpu.CompilerParams(
            dimension_semantics=("parallel",),
            vmem_limit_bytes=_VMEM_LIMIT),
    )(x2d, scale.reshape(1, C).astype(jnp.float32),
      shift.reshape(1, C).astype(jnp.float32))


def pallas_bn_relu_avgpool(x, scale, shift):
    """mean over H*W of relu(x*scale+shift); lane-dense (N, C) f32 output."""
    N, H, W, C = x.shape
    HW = H * W
    x3 = x.reshape(N, HW, C)
    if N <= 8:
        tb = N
    elif N % 8 == 0:
        tb = 8
    elif N % 4 == 0:
        tb = 4
    elif N % 2 == 0:
        tb = 2
    else:
        tb = 1
    out = pl.pallas_call(
        _bn_relu_pool_kernel,
        out_shape=jax.ShapeDtypeStruct((N, 1, C), jnp.float32),
        grid=(N // tb,),
        in_specs=[pl.BlockSpec((tb, HW, C), lambda i: (i, 0, 0)),
                  pl.BlockSpec((1, 1, C), lambda i: (0, 0, 0)),
                  pl.BlockSpec((1, 1, C), lambda i: (0, 0, 0))],
        out_specs=pl.BlockSpec((tb, 1, C), lambda i: (i, 0, 0)),
        compiler_params=pltpu.CompilerParams(
            dimension_semantics=("parallel",),
            vmem_limit_bytes=_VMEM_LIMIT),
    )(x3, scale.reshape(1, 1, C).astype(jnp.float32),
      shift.reshape(1, 1, C).astype(jnp.float32))
    return out.reshape(N, C)


# -----------------------------------------------------------------------------
# Model glue (im2col conv lowering; all GEMMs + epilogues run in Pallas)
# -----------------------------------------------------------------------------

def conv2d(x, wp, stride, padding, scale=None, shift=None, relu=False,
           residual=None, res_first=False):
    """x: (N,H,W,Cin) bf16; wp: prepped conv weight dict. Returns (N,Ho,Wo,Cout)."""
    N, H, W, Cin = x.shape
    kh, kw, cout = wp['kh'], wp['kw'], wp['cout']
    Ho = (H + 2 * padding - kh) // stride + 1
    Wo = (W + 2 * padding - kw) // stride + 1
    if kh == 1 and kw == 1 and padding == 0:
        cols = x[:, ::stride, ::stride, :].reshape(N * Ho * Wo, Cin)
    else:
        # TODO(synk): replace with an in-kernel tap reduction over the padded input.
        xp = jnp.pad(x, ((0, 0), (padding, padding), (padding, padding), (0, 0)))
        patches = []
        for i in range(kh):
            for j in range(kw):
                patches.append(
                    xp[:, i:i + (Ho - 1) * stride + 1:stride,
                          j:j + (Wo - 1) * stride + 1:stride, :])
        cols = jnp.concatenate(patches, axis=-1).reshape(N * Ho * Wo, kh * kw * Cin)
    out = pallas_matmul(cols, wp, scale=scale, shift=shift, residual=residual,
                        res_first=res_first, relu=relu, out_dtype=jnp.bfloat16)
    return out.reshape(N, Ho, Wo, cout)


def basic_block(x, b, next_bn=None):
    """One WRN BasicBlock (eval mode).  Downsample blocks ('shortcut' present)
    receive a pre-activated input: their bn1+relu was fused into the producing
    GEMM's epilogue.  next_bn=(scale, shift) fuses the NEXT downsample block's
    bn1+relu (applied after the residual add) into this block's conv2 epilogue."""
    N, H, W, Cin = x.shape
    cout = b['conv1']['cout']
    stride = b['stride']
    if 'shortcut' in b:                      # not equalInOut: x is already relu(bn1(.))
        o = x
        residual = conv2d(o, b['shortcut'], stride=stride, padding=0)
    else:                                    # equalInOut: residual is the raw input
        o = pallas_scale_shift_relu(x.reshape(-1, Cin),
                                    b['bn1_scale'], b['bn1_shift']
                                    ).reshape(N, H, W, Cin)
        residual = x
    # conv1 with bn2 + relu fused into the matmul epilogue
    out = conv2d(o, b['conv1'], stride=stride, padding=1,
                 scale=b['bn2_scale'], shift=b['bn2_shift'], relu=True)
    # dropout(p=0.5) is identity in eval mode
    Nn, Ho, Wo, _ = out.shape
    res2d = residual.reshape(Nn * Ho * Wo, cout)
    if next_bn is None:
        # conv2 with residual add fused into the epilogue
        out = conv2d(out, b['conv2'], stride=1, padding=1, residual=res2d)
    else:
        # conv2 + residual, then the NEXT downsample block's bn1 + relu, all fused
        out = conv2d(out, b['conv2'], stride=1, padding=1, residual=res2d,
                     scale=next_bn[0], shift=next_bn[1], relu=True,
                     res_first=True)
    return out


def encoder_forward(x_nchw, p):
    x = jnp.transpose(x_nchw, (0, 2, 3, 1)).astype(jnp.bfloat16)   # NCHW -> NHWC
    blocks = list(p['block1']) + list(p['block2']) + list(p['block3'])
    # Stem conv with block1[0]'s bn1+relu fused into its epilogue (block1[0] is a
    # downsample block, so its residual path also consumes the post-bn activation
    # and the pre-bn tensor is never needed).
    out = conv2d(x, p['conv1'], stride=1, padding=1,
                 scale=blocks[0]['bn1_scale'], shift=blocks[0]['bn1_shift'],
                 relu=True)
    for idx, b in enumerate(blocks):
        nxt = blocks[idx + 1] if idx + 1 < len(blocks) else None
        fuse = (nxt is not None) and ('shortcut' in nxt)
        out = basic_block(
            out, b,
            next_bn=(nxt['bn1_scale'], nxt['bn1_shift']) if fuse else None)
    # final bn + relu + global average pool fused in one kernel -> (N, 640) f32
    return pallas_bn_relu_avgpool(out, p['bn_final_scale'], p['bn_final_shift'])


def supcon_forward(x_nchw, p):
    feat = encoder_forward(x_nchw, p)                               # (N, 640)
    # projection head: Linear + bias + ReLU fused; Linear + bias + L2-norm fused
    h = pallas_matmul(feat, p['head_w1'], shift=p['head_b1'], relu=True)
    z = pallas_matmul(h, p['head_w2'], shift=p['head_b2'], l2norm=True,
                      out_dtype=jnp.float32)
    return z


# -----------------------------------------------------------------------------
# Parameter init (PyTorch-equivalent) and one-time prep (fold BN, flatten, bf16)
# -----------------------------------------------------------------------------

def _conv_init(key, kh, kw, cin, cout):
    n = kh * kw * cout
    return jax.random.normal(key, (kh, kw, cin, cout), jnp.float32) * math.sqrt(2.0 / n)


def _bn_init(c):
    return {'gamma': jnp.ones((c,), jnp.float32),
            'beta': jnp.zeros((c,), jnp.float32),
            'mean': jnp.zeros((c,), jnp.float32),
            'var': jnp.ones((c,), jnp.float32)}


def init_params(key):
    keys = iter(jax.random.split(key, 64))
    nC = [16, 160, 320, 640]          # widen_factor=10
    p = {'conv1': _conv_init(next(keys), 3, 3, 3, nC[0])}

    def make_block(cin, cout, stride):
        b = {'bn1': _bn_init(cin),
             'conv1': _conv_init(next(keys), 3, 3, cin, cout),
             'bn2': _bn_init(cout),
             'conv2': _conv_init(next(keys), 3, 3, cout, cout),
             'stride': stride}
        if cin != cout:
            b['shortcut'] = _conv_init(next(keys), 1, 1, cin, cout)
        return b

    def make_stage(cin, cout, stride, n_layers=4):   # depth=28 -> n=4 per stage
        blocks = [make_block(cin, cout, stride)]
        for _ in range(n_layers - 1):
            blocks.append(make_block(cout, cout, 1))
        return blocks

    p['block1'] = make_stage(nC[0], nC[1], 1)
    p['block2'] = make_stage(nC[1], nC[2], 2)
    p['block3'] = make_stage(nC[2], nC[3], 2)
    p['bn_final'] = _bn_init(nC[3])

    # projection head: Linear(640,512) -> ReLU -> Linear(512,128)
    p['head_w1'] = jax.random.normal(next(keys), (640, 512), jnp.float32) / math.sqrt(640.0)
    p['head_b1'] = jax.random.normal(next(keys), (512,), jnp.float32) * 0.01
    p['head_w2'] = jax.random.normal(next(keys), (512, 128), jnp.float32) / math.sqrt(512.0)
    p['head_b2'] = jax.random.normal(next(keys), (128,), jnp.float32) * 0.01
    return p


def _prep_conv(w):
    kh, kw, cin, cout = w.shape
    K = kh * kw * cin
    Kp = _round_up(K, 16)                 # bf16 sublane packing (only the stem pads)
    w2 = jnp.pad(w.reshape(K, cout).astype(jnp.bfloat16), ((0, Kp - K), (0, 0)))
    return {'w': w2, 'kh': kh, 'kw': kw, 'cout': cout, 'kpad': Kp}


def _prep_linear(w):
    K, N = w.shape
    Kp = _round_up(K, 16)
    w2 = jnp.pad(w.astype(jnp.bfloat16), ((0, Kp - K), (0, 0)))
    return {'w': w2, 'cout': N, 'kpad': Kp}


def prepare_params(raw, eps=1e-5):
    def fold(bn):
        scale = bn['gamma'] / jnp.sqrt(bn['var'] + eps)
        shift = bn['beta'] - bn['mean'] * scale
        return scale, shift

    p = {'conv1': _prep_conv(raw['conv1'])}
    for name in ('block1', 'block2', 'block3'):
        blocks = []
        for rb in raw[name]:
            b = {'stride': rb['stride'],
                 'conv1': _prep_conv(rb['conv1']),
                 'conv2': _prep_conv(rb['conv2'])}
            b['bn1_scale'], b['bn1_shift'] = fold(rb['bn1'])
            b['bn2_scale'], b['bn2_shift'] = fold(rb['bn2'])
            if 'shortcut' in rb:
                b['shortcut'] = _prep_conv(rb['shortcut'])
            blocks.append(b)
        p[name] = blocks
    p['bn_final_scale'], p['bn_final_shift'] = fold(raw['bn_final'])
    p['head_w1'] = _prep_linear(raw['head_w1'])
    p['head_b1'] = raw['head_b1']
    p['head_w2'] = _prep_linear(raw['head_w2'])
    p['head_b2'] = raw['head_b2']
    return p


# -----------------------------------------------------------------------------

if __name__ == "__main__":
    key = jax.random.PRNGKey(0)
    pkey, xkey = jax.random.split(key)
    params = prepare_params(init_params(pkey))

    # small input, NCHW like PyTorch: batch=2, 3 channels, 16x16 spatial
    x = jax.random.normal(xkey, (2, 3, 16, 16), jnp.float32)

    feat = supcon_forward(x, params)
    feat = jax.block_until_ready(feat)

    assert feat.shape == (2, 128), feat.shape
    assert bool(jnp.all(jnp.isfinite(feat)))
    norms = jnp.sqrt(jnp.sum(feat * feat, axis=1))
    assert bool(jnp.all(jnp.abs(norms - 1.0) < 1e-3))
    print("KERNEL_OK")
</pallas_src>

<mosaic_0001>
module attributes {stable_mosaic.version = 11 : i64} {
  func.func @kernel(%arg0: i32, %arg1: i32, %arg2: i32, %arg3: memref<512x32xbf16, #tpu.memory_space<vmem>>, %arg4: memref<32x16xbf16, #tpu.memory_space<vmem>>, %arg5: memref<1x16xf32, #tpu.memory_space<vmem>>, %arg6: memref<1x16xf32, #tpu.memory_space<vmem>>, %arg7: memref<512x16xbf16, #tpu.memory_space<vmem>>) attributes {dimension_semantics = [#tpu.dimension_semantics<parallel>, #tpu.dimension_semantics<parallel>, #tpu.dimension_semantics<arbitrary>], iteration_bounds = array<i64: 1, 1, 1>, scalar_prefetch = 0 : i64, scratch_operands = 0 : i64, tpu.core_type = #tpu.core_type<tc>, window_params = [{transform_indices = @transform_0, window_bounds = array<i64: 512, 32>}, {transform_indices = @transform_1, window_bounds = array<i64: 32, 16>}, {transform_indices = @transform_2, window_bounds = array<i64: 1, 16>}, {transform_indices = @transform_3, window_bounds = array<i64: 1, 16>}, {transform_indices = @transform_4, window_bounds = array<i64: 512, 16>}]} {
    %c0 = arith.constant 0 : index
    %c0_0 = arith.constant 0 : index
    %0 = vector.load %arg3[%c0, %c0_0] : memref<512x32xbf16, #tpu.memory_space<vmem>>, vector<512x32xbf16>
    %c0_1 = arith.constant 0 : index
    %c0_2 = arith.constant 0 : index
    %1 = vector.load %arg4[%c0_1, %c0_2] : memref<32x16xbf16, #tpu.memory_space<vmem>>, vector<32x16xbf16>
    %cst = arith.constant dense<0.000000e+00> : vector<512x16xf32>
    %2 = tpu.matmul %0, %1, %cst {dimension_numbers = #tpu.dot_dimension_numbers<[1], [0], [0], [1], [0, 0, 1, 1], [], []>} : vector<512x32xbf16>, vector<32x16xbf16>, vector<512x16xf32> -> vector<512x16xf32>
    %c0_3 = arith.constant 0 : index
    %c0_4 = arith.constant 0 : index
    %3 = vector.load %arg5[%c0_3, %c0_4] : memref<1x16xf32, #tpu.memory_space<vmem>>, vector<1x16xf32>
    %4 = vector.broadcast %3 : vector<1x16xf32> to vector<512x16xf32>
    %5 = arith.mulf %2, %4 : vector<512x16xf32>
    %c0_5 = arith.constant 0 : index
    %c0_6 = arith.constant 0 : index
    %6 = vector.load %arg6[%c0_5, %c0_6] : memref<1x16xf32, #tpu.memory_space<vmem>>, vector<1x16xf32>
    %7 = vector.broadcast %6 : vector<1x16xf32> to vector<512x16xf32>
    %8 = arith.addf %5, %7 : vector<512x16xf32>
    %cst_7 = arith.constant 0.000000e+00 : f32
    %9 = vector.broadcast %cst_7 : f32 to vector<512x16xf32>
    %10 = arith.maximumf %8, %9 : vector<512x16xf32>
    %11 = arith.truncf %10 : vector<512x16xf32> to vector<512x16xbf16>
    %c0_8 = arith.constant 0 : index
    %c0_9 = arith.constant 0 : index
    %12 = vector.load %arg7[%c0_8, %c0_9] : memref<512x16xbf16, #tpu.memory_space<vmem>>, vector<512x16xbf16>
    tpu.vector_store %arg7[%c0_8, %c0_9], %11 {strides = array<i32>} : memref<512x16xbf16, #tpu.memory_space<vmem>>, vector<512x16xbf16>,
    return
  }
  func.func @transform_0(%arg0: i32, %arg1: i32, %arg2: i32) -> (i32, i32) {
    %c0_i32 = arith.constant 0 : i32
    return %arg0, %arg2 : i32, i32
  }
  func.func @transform_1(%arg0: i32, %arg1: i32, %arg2: i32) -> (i32, i32) {
    %c0_i32 = arith.constant 0 : i32
    return %arg2, %arg1 : i32, i32
  }
  func.func @transform_2(%arg0: i32, %arg1: i32, %arg2: i32) -> (i32, i32) {
    %c0_i32 = arith.constant 0 : i32
    %c0_i32_0 = arith.constant 0 : i32
    return %c0_i32, %arg1 : i32, i32
  }
  func.func @transform_3(%arg0: i32, %arg1: i32, %arg2: i32) -> (i32, i32) {
    %c0_i32 = arith.constant 0 : i32
    %c0_i32_0 = arith.constant 0 : i32
    return %c0_i32, %arg1 : i32, i32
  }
  func.func @transform_4(%arg0: i32, %arg1: i32, %arg2: i32) -> (i32, i32) {
    %c0_i32 = arith.constant 0 : i32
    return %arg0, %arg1 : i32, i32
  }
}

</mosaic_0001>

<bundles_post_ra>
// kernel: tpu_custom_call.1
= control target key start
LH: loop header
LB: loop body
LE: loop exit
PB: predicated region body
PF: predicated region fallthrough
CT: control target
= control target key end

     0   :  { %vm258_vm0 = vcmask 261120   ;;  %vm1106_vm1 = vcmask 125952   ;;  %s2064_s1 = inlined_call_operand.vmem [shape: bf16[32,16], index: 1, kind: input, shape index: {}]   ;;  %s2065_s0 = inlined_call_operand.vmem [shape: bf16[512,32], index: 0, kind: input, shape index: {}]   ;;  %s2066_s2 = inlined_call_operand.vmem [shape: f32[1,16], index: 2, kind: input, shape index: {}]   ;;  %s2067_s3 = inlined_call_operand.vmem [shape: f32[1,16], index: 3, kind: input, shape index: {}]   ;;  %s2068_s4 = inlined_call_operand.vmem [shape: bf16[512,16], index: 4, kind: output, shape index: {}]  }
   0x1   :  { %v1477_v0 = vld [vmem:[%s2064_s1 + $0x8] sm:$0xff]   ;;  %v1478_v1 = vld [vmem:[%s2064_s1] sm:$0xff]   ;;  %v1483_v6 = vld [vmem:[%s2065_s0 + $0x10] sm:$0xff]  }
   0x2   :  { %1405 = vmatprep.subr.bf16.mxu0 %v1477_v0  ;;  %1473 = vmatprep.subr.bf16.mxu1 %v1477_v0  ;;  %v1479_v2 = vld [vmem:[%s2065_s0] sm:$0xff]   ;;  %v1481_v4 = vld [vmem:[%s2065_s0 + $0x8] sm:$0xff]   ;;  %v1484_v7 = vld [vmem:[%s2065_s0 + $0x90] sm:$0xff]  }
   0x3   :  { %1406 = vmatpush3.bf16.msra.mxu0 %v1477_v0  ;;  %1475 = vmatpush3.bf16.msra.mxu1 %v1477_v0  ;;  %v1480_v3 = vld [vmem:[%s2065_s0 + $0x80] sm:$0xff]   ;;  %v1482_v5 = vld [vmem:[%s2065_s0 + $0x88] sm:$0xff]   ;;  %v1485_v8 = vld [vmem:[%s2065_s0 + $0x18] sm:$0xff]  }
   0x4   :  { %1407 = vmatprep.subr.bf16.mxu0 %v1478_v1  ;;  %1474 = vmatprep.subr.bf16.mxu1 %v1478_v1  ;;  %v1486_v9 = vld [vmem:[%s2065_s0 + $0x98] sm:$0xff]   ;;  %v1487_v10 = vld [vmem:[%s2065_s0 + $0x20] sm:$0xff]   ;;  %v1489_v12 = vld [vmem:[%s2065_s0 + $0x28] sm:$0xff]  }
   0x5   :  { %1409 = vmatprep.mubr.msk.bf16.mxu0 %vm258_vm0, %v1479_v2  ;;  %1441 = vmatprep.mubr.msk.bf16.mxu1 %vm258_vm0, %v1480_v3  ;;  %v1488_v11 = vld [vmem:[%s2065_s0 + $0xa0] sm:$0xff]   ;;  %v1490_v13 = vld [vmem:[%s2065_s0 + $0xa8] sm:$0xff]   ;;  %v1491_v14 = vld [vmem:[%s2065_s0 + $0x30] sm:$0xff]  }
   0x6   :  { %v1492_v15 = vld [vmem:[%s2065_s0 + $0xb0] sm:$0xff]   ;;  %v1493_v16 = vld [vmem:[%s2065_s0 + $0x38] sm:$0xff]   ;;  %v1495_v18 = vld [vmem:[%s2065_s0 + $0x40] sm:$0xff]  }
   0x7   :  { %1408 = vmatpush3.bf16.msra.mxu0 %v1478_v1  ;;  %1476 = vmatpush3.bf16.msra.mxu1 %v1478_v1  ;;  %v1494_v17 = vld [vmem:[%s2065_s0 + $0xb8] sm:$0xff]   ;;  %v1496_v19 = vld [vmem:[%s2065_s0 + $0xc0] sm:$0xff]   ;;  %v1497_v20 = vld [vmem:[%s2065_s0 + $0x48] sm:$0xff]  }
   0x8   :  { %v1498_v21 = vld [vmem:[%s2065_s0 + $0xc8] sm:$0xff]   ;;  %v1499_v22 = vld [vmem:[%s2065_s0 + $0x50] sm:$0xff]   ;;  %v1501_v24 = vld [vmem:[%s2065_s0 + $0x58] sm:$0xff]  }
   0x9   :  { %v1500_v23 = vld [vmem:[%s2065_s0 + $0xd0] sm:$0xff]   ;;  %v1502_v25 = vld [vmem:[%s2065_s0 + $0xd8] sm:$0xff]   ;;  %v1503_v26 = vld [vmem:[%s2065_s0 + $0x60] sm:$0xff]  }
   0xa   :  { %1410 = vmatmul.mubr.msk.bf16.vlgmr.msra.gmra.mxu0 %vm258_vm0, %v1481_v4  ;;  %1442 = vmatmul.mubr.msk.bf16.vlgmr.msra.gmra.mxu1 %vm258_vm0, %v1482_v5  ;;  %v1504_v27 = vld [vmem:[%s2065_s0 + $0xe0] sm:$0xff]   ;;  %v1505_v28 = vld [vmem:[%s2065_s0 + $0x68] sm:$0xff]   ;;  %v1507_v30 = vld [vmem:[%s2065_s0 + $0x70] sm:$0xff]  }
   0xb   :  { %1413 = vmatprep.mubr.msk.bf16.mxu0 %vm258_vm0, %v1483_v6  ;;  %1445 = vmatprep.mubr.msk.bf16.mxu1 %vm258_vm0, %v1484_v7  ;;  %v1506_v29 = vld [vmem:[%s2065_s0 + $0xe8] sm:$0xff]   ;;  %v1508_v31 = vld [vmem:[%s2065_s0 + $0xf0] sm:$0xff]   ;;  %v1509_v32 = vld [vmem:[%s2065_s0 + $0x78] sm:$0xff]  }
   0xc   :  { %v1510_v33 = vld [vmem:[%s2065_s0 + $0xf8] sm:$0xff]   ;;  %v1673_v34 = vld [vmem:[%s2066_s2] ss:$0 sm:$0xff] }
   0xd   :  { %v1678_v36 = vld [vmem:[%s2067_s3] ss:$0 sm:$0xff] }
  0x12   :  { %1414 = vmatmul.mubr.msk.bf16.gmra.mxu0 %vm258_vm0, %v1485_v8  ;;  %1446 = vmatmul.mubr.msk.bf16.gmra.mxu1 %vm258_vm0, %v1486_v9 }
  0x13   :  { %1417 = vmatprep.mubr.msk.bf16.mxu0 %vm258_vm0, %v1487_v10  ;;  %1449 = vmatprep.mubr.msk.bf16.mxu1 %vm258_vm0, %v1488_v11 }
  0x1a   :  { %1418 = vmatmul.mubr.msk.bf16.gmra.mxu0 %vm258_vm0, %v1489_v12  ;;  %1450 = vmatmul.mubr.msk.bf16.gmra.mxu1 %vm258_vm0, %v1490_v13 }
  0x1b   :  { %1421 = vmatprep.mubr.msk.bf16.mxu0 %vm258_vm0, %v1491_v14  ;;  %1453 = vmatprep.mubr.msk.bf16.mxu1 %vm258_vm0, %v1492_v15 }
  0x22   :  { %1422 = vmatmul.mubr.msk.bf16.gmra.mxu0 %vm258_vm0, %v1493_v16  ;;  %1454 = vmatmul.mubr.msk.bf16.gmra.mxu1 %vm258_vm0, %v1494_v17 }
  0x23   :  { %1425 = vmatprep.mubr.msk.bf16.mxu0 %vm258_vm0, %v1495_v18  ;;  %1457 = vmatprep.mubr.msk.bf16.mxu1 %vm258_vm0, %v1496_v19 }
  0x2a   :  { %1426 = vmatmul.mubr.msk.bf16.gmra.mxu0 %vm258_vm0, %v1497_v20  ;;  %1458 = vmatmul.mubr.msk.bf16.gmra.mxu1 %vm258_vm0, %v1498_v21 }
  0x2b   :  { %1429 = vmatprep.mubr.msk.bf16.mxu0 %vm258_vm0, %v1499_v22  ;;  %1461 = vmatprep.mubr.msk.bf16.mxu1 %vm258_vm0, %v1500_v23 }
  0x32   :  { %1430 = vmatmul.mubr.msk.bf16.gmra.mxu0 %vm258_vm0, %v1501_v24  ;;  %1462 = vmatmul.mubr.msk.bf16.gmra.mxu1 %vm258_vm0, %v1502_v25 }
  0x33   :  { %1433 = vmatprep.mubr.msk.bf16.mxu0 %vm258_vm0, %v1503_v26  ;;  %1465 = vmatprep.mubr.msk.bf16.mxu1 %vm258_vm0, %v1504_v27 }
  0x3a   :  { %1434 = vmatmul.mubr.msk.bf16.gmra.mxu0 %vm258_vm0, %v1505_v28  ;;  %1466 = vmatmul.mubr.msk.bf16.gmra.mxu1 %vm258_vm0, %v1506_v29 }
  0x3b   :  { %1437 = vmatprep.mubr.msk.bf16.mxu0 %vm258_vm0, %v1507_v30  ;;  %1469 = vmatprep.mubr.msk.bf16.mxu1 %vm258_vm0, %v1508_v31 }
  0x42   :  { %1438 = vmatmul.mubr.msk.bf16.gmra.mxu0 %vm258_vm0, %v1509_v32  ;;  %1470 = vmatmul.mubr.msk.bf16.gmra.mxu1 %vm258_vm0, %v1510_v33 }
  0xca   :  { %v1411_v35 = vpop.f32.mrf.mxu0  ;;  %v1443_v37 = vpop.f32.mrf.mxu1 }
  0xcb   :  { %v653_v38 = vmul.f32 %v1411_v35, %v1673_v34  ;;  %v685_v39 = vmul.f32 %v1443_v37, %v1673_v34 }
  0xcc   :  { %v389_v40 = vpop.f32.mrf.mxu0  ;;  %v517_v41 = vpop.f32.mrf.mxu1 }
  0xcd   :  { %v724_v42 = vadd.f32 %v1678_v36, %v653_v38  ;;  %v756_v43 = vadd.f32 %v1678_v36, %v685_v39  ;;  %v651_v44 = vmul.f32 %v1673_v34, %v389_v40  ;;  %v683_v45 = vmul.f32 %v1673_v34, %v517_v41 }
  0xce   :  { %v1412_v46 = vpop.f32.mrf.mxu0  ;;  %v1444_v47 = vpop.f32.mrf.mxu1 }
  0xcf   :  { %v788_v48 = vmax.f32 %v724_v42, 0.0  ;;  %v820_v49 = vmax.f32 %v756_v43, 0.0  ;;  %v722_v50 = vadd.f32 %v1678_v36, %v651_v44  ;;  %v754_v51 = vadd.f32 %v1678_v36, %v683_v45 }
  0xd0   :  { %v654_v52 = vmul.f32 %v1412_v46, %v1673_v34  ;;  %v686_v53 = vmul.f32 %v1444_v47, %v1673_v34  ;;  %v392_v54 = vpop.f32.mrf.mxu0  ;;  %v520_v55 = vpop.f32.mrf.mxu1 }
  0xd1   :  { %v1309_v56 = vpack.c.bf16 %v788_v48, %v788_v48  ;;  %v1341_v57 = vpack.c.bf16 %v820_v49, %v820_v49  ;;  %v786_v58 = vmax.f32 %v722_v50, 0.0  ;;  %v818_v59 = vmax.f32 %v754_v51, 0.0 }
  0xd2   :  { %v725_v60 = vadd.f32 %v1678_v36, %v654_v52  ;;  %v757_v61 = vadd.f32 %v1678_v36, %v686_v53  ;;  %v652_v62 = vmul.f32 %v1673_v34, %v392_v54  ;;  %v684_v63 = vmul.f32 %v1673_v34, %v520_v55  ;;  %v1415_v0 = vpop.f32.mrf.mxu0  ;;  %v1447_v1 = vpop.f32.mrf.mxu1 }
  0xd3   :  { %1109 = vst.msk [vmem:[%s2068_s4 + $0x8] sm:$0xf] %vm1106_vm1, %v1309_v56  ;;  %1141 = vst.msk [vmem:[%s2068_s4 + $0x88] sm:$0xf] %vm1106_vm1, %v1341_v57  ;;  %v1307_v2 = vpack.c.bf16 %v786_v58, %v786_v58  ;;  %v1339_v3 = vpack.c.bf16 %v818_v59, %v818_v59  ;;  %v657_v4 = vmul.f32 %v1415_v0, %v1673_v34 }
  0xd4   :  { %v689_v5 = vmul.f32 %v1447_v1, %v1673_v34  ;;  %v789_v6 = vmax.f32 %v725_v60, 0.0  ;;  %v821_v7 = vmax.f32 %v757_v61, 0.0  ;;  %v723_v8 = vadd.f32 %v1678_v36, %v652_v62  ;;  %v405_v10 = vpop.f32.mrf.mxu0  ;;  %v533_v11 = vpop.f32.mrf.mxu1 }
  0xd5   :  { %v755_v9 = vadd.f32 %v1678_v36, %v684_v63  ;;  %1107 = vst.msk [vmem:[%s2068_s4] sm:$0xf] %vm1106_vm1, %v1307_v2  ;;  %1139 = vst.msk [vmem:[%s2068_s4 + $0x80] sm:$0xf] %vm1106_vm1, %v1339_v3  ;;  %v728_v12 = vadd.f32 %v1678_v36, %v657_v4  ;;  %v655_v14 = vmul.f32 %v1673_v34, %v405_v10 }
  0xd6   :  { %v760_v13 = vadd.f32 %v1678_v36, %v689_v5  ;;  %v687_v15 = vmul.f32 %v1673_v34, %v533_v11  ;;  %v1310_v16 = vpack.c.bf16 %v789_v6, %v789_v6  ;;  %v1342_v17 = vpack.c.bf16 %v821_v7, %v821_v7  ;;  %v1416_v20 = vpop.f32.mrf.mxu0  ;;  %v1448_v21 = vpop.f32.mrf.mxu1 }
  0xd7   :  { %v787_v18 = vmax.f32 %v723_v8, 0.0  ;;  %v819_v19 = vmax.f32 %v755_v9, 0.0  ;;  %v792_v22 = vmax.f32 %v728_v12, 0.0  ;;  %v726_v24 = vadd.f32 %v1678_v36, %v655_v14 }
  0xd8   :  { %v824_v23 = vmax.f32 %v760_v13, 0.0  ;;  %v758_v25 = vadd.f32 %v1678_v36, %v687_v15  ;;  %1110 = vst.msk [vmem:[%s2068_s4 + $0xc] sm:$0xf] %vm1106_vm1, %v1310_v16  ;;  %1142 = vst.msk [vmem:[%s2068_s4 + $0x8c] sm:$0xf] %vm1106_vm1, %v1342_v17  ;;  %v658_v28 = vmul.f32 %v1416_v20, %v1673_v34  ;;  %v690_v29 = vmul.f32 %v1448_v21, %v1673_v34  ;;  %v408_v30 = vpop.f32.mrf.mxu0  ;;  %v536_v31 = vpop.f32.mrf.mxu1 }
  0xd9   :  { %v1308_v26 = vpack.c.bf16 %v787_v18, %v787_v18  ;;  %v1340_v27 = vpack.c.bf16 %v819_v19, %v819_v19  ;;  %v1313_v32 = vpack.c.bf16 %v792_v22, %v792_v22  ;;  %v790_v35 = vmax.f32 %v726_v24, 0.0 }
  0xda   :  { %v1345_v33 = vpack.c.bf16 %v824_v23, %v824_v23  ;;  %v822_v37 = vmax.f32 %v758_v25, 0.0  ;;  %v729_v38 = vadd.f32 %v1678_v36, %v658_v28  ;;  %v761_v39 = vadd.f32 %v1678_v36, %v690_v29  ;;  %v1419_v42 = vpop.f32.mrf.mxu0  ;;  %v1451_v43 = vpop.f32.mrf.mxu1 }
  0xdb   :  { %1108 = vst.msk [vmem:[%s2068_s4 + $0x4] sm:$0xf] %vm1106_vm1, %v1308_v26  ;;  %1140 = vst.msk [vmem:[%s2068_s4 + $0x84] sm:$0xf] %vm1106_vm1, %v1340_v27  ;;  %v656_v40 = vmul.f32 %v1673_v34, %v408_v30  ;;  %v688_v41 = vmul.f32 %v1673_v34, %v536_v31  ;;  %v1311_v44 = vpack.c.bf16 %v790_v35, %v790_v35 }
  0xdc   :  { %1113 = vst.msk [vmem:[%s2068_s4 + $0x18] sm:$0xf] %vm1106_vm1, %v1313_v32  ;;  %1145 = vst.msk [vmem:[%s2068_s4 + $0x98] sm:$0xf] %vm1106_vm1, %v1345_v33  ;;  %v1343_v45 = vpack.c.bf16 %v822_v37, %v822_v37  ;;  %v661_v46 = vmul.f32 %v1419_v42, %v1673_v34  ;;  %v693_v47 = vmul.f32 %v1451_v43, %v1673_v34  ;;  %v793_v48 = vmax.f32 %v729_v38, 0.0  ;;  %v421_v52 = vpop.f32.mrf.mxu0  ;;  %v549_v53 = vpop.f32.mrf.mxu1 }
  0xdd   :  { %v825_v49 = vmax.f32 %v761_v39, 0.0  ;;  %v727_v50 = vadd.f32 %v1678_v36, %v656_v40  ;;  %v759_v51 = vadd.f32 %v1678_v36, %v688_v41  ;;  %1111 = vst.msk [vmem:[%s2068_s4 + $0x10] sm:$0xf] %vm1106_vm1, %v1311_v44  ;;  %v659_v56 = vmul.f32 %v1673_v34, %v421_v52 }
  0xde   :  { %1143 = vst.msk [vmem:[%s2068_s4 + $0x90] sm:$0xf] %vm1106_vm1, %v1343_v45  ;;  %v732_v54 = vadd.f32 %v1678_v36, %v661_v46  ;;  %v764_v55 = vadd.f32 %v1678_v36, %v693_v47  ;;  %v691_v57 = vmul.f32 %v1673_v34, %v549_v53  ;;  %v1314_v58 = vpack.c.bf16 %v793_v48, %v793_v48  ;;  %v1420_v62 = vpop.f32.mrf.mxu0  ;;  %v1452_v63 = vpop.f32.mrf.mxu1 }
  0xdf   :  { %v1346_v59 = vpack.c.bf16 %v825_v49, %v825_v49  ;;  %v791_v60 = vmax.f32 %v727_v50, 0.0  ;;  %v823_v61 = vmax.f32 %v759_v51, 0.0  ;;  %v730_v2 = vadd.f32 %v1678_v36, %v659_v56 }
  0xe0   :  { %v796_v0 = vmax.f32 %v732_v54, 0.0  ;;  %v828_v1 = vmax.f32 %v764_v55, 0.0  ;;  %v762_v3 = vadd.f32 %v1678_v36, %v691_v57  ;;  %1114 = vst.msk [vmem:[%s2068_s4 + $0x1c] sm:$0xf] %vm1106_vm1, %v1314_v58  ;;  %v662_v6 = vmul.f32 %v1420_v62, %v1673_v34  ;;  %v424_v8 = vpop.f32.mrf.mxu0  ;;  %v552_v9 = vpop.f32.mrf.mxu1 }
  0xe1   :  { %1146 = vst.msk [vmem:[%s2068_s4 + $0x9c] sm:$0xf] %vm1106_vm1, %v1346_v59  ;;  %v1312_v4 = vpack.c.bf16 %v791_v60, %v791_v60  ;;  %v1344_v5 = vpack.c.bf16 %v823_v61, %v823_v61  ;;  %v694_v7 = vmul.f32 %v1452_v63, %v1673_v34  ;;  %v794_v12 = vmax.f32 %v730_v2, 0.0 }
  0xe2   :  { %v1317_v10 = vpack.c.bf16 %v796_v0, %v796_v0  ;;  %v1349_v11 = vpack.c.bf16 %v828_v1, %v828_v1  ;;  %v826_v13 = vmax.f32 %v762_v3, 0.0  ;;  %v733_v14 = vadd.f32 %v1678_v36, %v662_v6  ;;  %v1423_v18 = vpop.f32.mrf.mxu0  ;;  %v1455_v19 = vpop.f32.mrf.mxu1 }
  0xe3   :  { %1112 = vst.msk [vmem:[%s2068_s4 + $0x14] sm:$0xf] %vm1106_vm1, %v1312_v4  ;;  %1144 = vst.msk [vmem:[%s2068_s4 + $0x94] sm:$0xf] %vm1106_vm1, %v1344_v5  ;;  %v765_v15 = vadd.f32 %v1678_v36, %v694_v7  ;;  %v660_v16 = vmul.f32 %v1673_v34, %v424_v8  ;;  %v692_v17 = vmul.f32 %v1673_v34, %v552_v9 }
  0xe4   :  { %1117 = vst.msk [vmem:[%s2068_s4 + $0x28] sm:$0xf] %vm1106_vm1, %v1317_v10  ;;  %1149 = vst.msk [vmem:[%s2068_s4 + $0xa8] sm:$0xf] %vm1106_vm1, %v1349_v11  ;;  %v1315_v20 = vpack.c.bf16 %v794_v12, %v794_v12  ;;  %v1347_v21 = vpack.c.bf16 %v826_v13, %v826_v13  ;;  %v665_v22 = vmul.f32 %v1423_v18, %v1673_v34  ;;  %v797_v24 = vmax.f32 %v733_v14, 0.0  ;;  %v437_v28 = vpop.f32.mrf.mxu0  ;;  %v565_v29 = vpop.f32.mrf.mxu1 }
  0xe5   :  { %v697_v23 = vmul.f32 %v1455_v19, %v1673_v34  ;;  %v829_v25 = vmax.f32 %v765_v15, 0.0  ;;  %v731_v26 = vadd.f32 %v1678_v36, %v660_v16  ;;  %v763_v27 = vadd.f32 %v1678_v36, %v692_v17 }
  0xe6   :  { %1115 = vst.msk [vmem:[%s2068_s4 + $0x20] sm:$0xf] %vm1106_vm1, %v1315_v20  ;;  %1147 = vst.msk [vmem:[%s2068_s4 + $0xa0] sm:$0xf] %vm1106_vm1, %v1347_v21  ;;  %v736_v30 = vadd.f32 %v1678_v36, %v665_v22  ;;  %v663_v32 = vmul.f32 %v1673_v34, %v437_v28  ;;  %v695_v33 = vmul.f32 %v1673_v34, %v565_v29  ;;  %v1424_v40 = vpop.f32.mrf.mxu0  ;;  %v1456_v41 = vpop.f32.mrf.mxu1 }
  0xe7   :  { %v768_v31 = vadd.f32 %v1678_v36, %v697_v23  ;;  %v1318_v35 = vpack.c.bf16 %v797_v24, %v797_v24  ;;  %v1350_v37 = vpack.c.bf16 %v829_v25, %v829_v25  ;;  %v795_v38 = vmax.f32 %v731_v26, 0.0 }
  0xe8   :  { %v827_v39 = vmax.f32 %v763_v27, 0.0  ;;  %v800_v42 = vmax.f32 %v736_v30, 0.0  ;;  %v734_v44 = vadd.f32 %v1678_v36, %v663_v32  ;;  %v766_v45 = vadd.f32 %v1678_v36, %v695_v33  ;;  %v440_v50 = vpop.f32.mrf.mxu0  ;;  %v568_v51 = vpop.f32.mrf.mxu1 }
  0xe9   :  { %v832_v43 = vmax.f32 %v768_v31, 0.0  ;;  %1118 = vst.msk [vmem:[%s2068_s4 + $0x2c] sm:$0xf] %vm1106_vm1, %v1318_v35  ;;  %1150 = vst.msk [vmem:[%s2068_s4 + $0xac] sm:$0xf] %vm1106_vm1, %v1350_v37  ;;  %v1316_v46 = vpack.c.bf16 %v795_v38, %v795_v38  ;;  %v666_v48 = vmul.f32 %v1424_v40, %v1673_v34  ;;  %v698_v49 = vmul.f32 %v1456_v41, %v1673_v34 }
  0xea   :  { %v1348_v47 = vpack.c.bf16 %v827_v39, %v827_v39  ;;  %v1321_v52 = vpack.c.bf16 %v800_v42, %v800_v42  ;;  %v798_v54 = vmax.f32 %v734_v44, 0.0  ;;  %v830_v55 = vmax.f32 %v766_v45, 0.0  ;;  %v1427_v60 = vpop.f32.mrf.mxu0  ;;  %v1459_v61 = vpop.f32.mrf.mxu1 }
  0xeb   :  { %v1353_v53 = vpack.c.bf16 %v832_v43, %v832_v43  ;;  %1116 = vst.msk [vmem:[%s2068_s4 + $0x24] sm:$0xf] %vm1106_vm1, %v1316_v46  ;;  %v737_v56 = vadd.f32 %v1678_v36, %v666_v48  ;;  %v769_v57 = vadd.f32 %v1678_v36, %v698_v49  ;;  %v664_v58 = vmul.f32 %v1673_v34, %v440_v50 }
  0xec   :  { %1148 = vst.msk [vmem:[%s2068_s4 + $0xa4] sm:$0xf] %vm1106_vm1, %v1348_v47  ;;  %v696_v59 = vmul.f32 %v1673_v34, %v568_v51  ;;  %1121 = vst.msk [vmem:[%s2068_s4 + $0x38] sm:$0xf] %vm1106_vm1, %v1321_v52  ;;  %v1319_v62 = vpack.c.bf16 %v798_v54, %v798_v54  ;;  %v1351_v63 = vpack.c.bf16 %v830_v55, %v830_v55  ;;  %v453_v6 = vpop.f32.mrf.mxu0  ;;  %v581_v7 = vpop.f32.mrf.mxu1 }
  0xed   :  { %1153 = vst.msk [vmem:[%s2068_s4 + $0xb8] sm:$0xf] %vm1106_vm1, %v1353_v53  ;;  %v669_v0 = vmul.f32 %v1427_v60, %v1673_v34  ;;  %v701_v1 = vmul.f32 %v1459_v61, %v1673_v34  ;;  %v801_v2 = vmax.f32 %v737_v56, 0.0  ;;  %v833_v3 = vmax.f32 %v769_v57, 0.0 }
  0xee   :  { %v735_v4 = vadd.f32 %v1678_v36, %v664_v58  ;;  %v767_v5 = vadd.f32 %v1678_v36, %v696_v59  ;;  %1119 = vst.msk [vmem:[%s2068_s4 + $0x30] sm:$0xf] %vm1106_vm1, %v1319_v62  ;;  %1151 = vst.msk [vmem:[%s2068_s4 + $0xb0] sm:$0xf] %vm1106_vm1, %v1351_v63  ;;  %v667_v10 = vmul.f32 %v1673_v34, %v453_v6  ;;  %v1428_v16 = vpop.f32.mrf.mxu0  ;;  %v1460_v17 = vpop.f32.mrf.mxu1 }
  0xef   :  { %v740_v8 = vadd.f32 %v1678_v36, %v669_v0  ;;  %v772_v9 = vadd.f32 %v1678_v36, %v701_v1  ;;  %v699_v11 = vmul.f32 %v1673_v34, %v581_v7  ;;  %v1322_v12 = vpack.c.bf16 %v801_v2, %v801_v2 }
  0xf0   :  { %v1354_v13 = vpack.c.bf16 %v833_v3, %v833_v3  ;;  %v799_v14 = vmax.f32 %v735_v4, 0.0  ;;  %v831_v15 = vmax.f32 %v767_v5, 0.0  ;;  %v738_v20 = vadd.f32 %v1678_v36, %v667_v10  ;;  %v456_v26 = vpop.f32.mrf.mxu0  ;;  %v584_v27 = vpop.f32.mrf.mxu1 }
  0xf1   :  { %v804_v18 = vmax.f32 %v740_v8, 0.0  ;;  %v836_v19 = vmax.f32 %v772_v9, 0.0  ;;  %v770_v21 = vadd.f32 %v1678_v36, %v699_v11  ;;  %1122 = vst.msk [vmem:[%s2068_s4 + $0x3c] sm:$0xf] %vm1106_vm1, %v1322_v12  ;;  %v670_v24 = vmul.f32 %v1428_v16, %v1673_v34 }
  0xf2   :  { %1154 = vst.msk [vmem:[%s2068_s4 + $0xbc] sm:$0xf] %vm1106_vm1, %v1354_v13  ;;  %v1320_v22 = vpack.c.bf16 %v799_v14, %v799_v14  ;;  %v1352_v23 = vpack.c.bf16 %v831_v15, %v831_v15  ;;  %v702_v25 = vmul.f32 %v1460_v17, %v1673_v34  ;;  %v802_v30 = vmax.f32 %v738_v20, 0.0  ;;  %v1431_v38 = vpop.f32.mrf.mxu0  ;;  %v1463_v39 = vpop.f32.mrf.mxu1 }
  0xf3   :  { %v1325_v28 = vpack.c.bf16 %v804_v18, %v804_v18  ;;  %v1357_v29 = vpack.c.bf16 %v836_v19, %v836_v19  ;;  %v834_v31 = vmax.f32 %v770_v21, 0.0  ;;  %v741_v32 = vadd.f32 %v1678_v36, %v670_v24 }
  0xf4   :  { %1120 = vst.msk [vmem:[%s2068_s4 + $0x34] sm:$0xf] %vm1106_vm1, %v1320_v22  ;;  %1152 = vst.msk [vmem:[%s2068_s4 + $0xb4] sm:$0xf] %vm1106_vm1, %v1352_v23  ;;  %v773_v33 = vadd.f32 %v1678_v36, %v702_v25  ;;  %v668_v35 = vmul.f32 %v1673_v34, %v456_v26  ;;  %v700_v37 = vmul.f32 %v1673_v34, %v584_v27  ;;  %v469_v48 = vpop.f32.mrf.mxu0  ;;  %v597_v49 = vpop.f32.mrf.mxu1 }
  0xf5   :  { %1125 = vst.msk [vmem:[%s2068_s4 + $0x48] sm:$0xf] %vm1106_vm1, %v1325_v28  ;;  %1157 = vst.msk [vmem:[%s2068_s4 + $0xc8] sm:$0xf] %vm1106_vm1, %v1357_v29  ;;  %v1323_v40 = vpack.c.bf16 %v802_v30, %v802_v30  ;;  %v1355_v41 = vpack.c.bf16 %v834_v31, %v834_v31  ;;  %v673_v42 = vmul.f32 %v1431_v38, %v1673_v34  ;;  %v805_v44 = vmax.f32 %v741_v32, 0.0 }
  0xf6   :  { %v705_v43 = vmul.f32 %v1463_v39, %v1673_v34  ;;  %v837_v45 = vmax.f32 %v773_v33, 0.0  ;;  %v739_v46 = vadd.f32 %v1678_v36, %v668_v35  ;;  %v771_v47 = vadd.f32 %v1678_v36, %v700_v37  ;;  %v1432_v58 = vpop.f32.mrf.mxu0  ;;  %v1464_v59 = vpop.f32.mrf.mxu1 }
  0xf7   :  { %1123 = vst.msk [vmem:[%s2068_s4 + $0x40] sm:$0xf] %vm1106_vm1, %v1323_v40  ;;  %1155 = vst.msk [vmem:[%s2068_s4 + $0xc0] sm:$0xf] %vm1106_vm1, %v1355_v41  ;;  %v744_v50 = vadd.f32 %v1678_v36, %v673_v42  ;;  %v671_v52 = vmul.f32 %v1673_v34, %v469_v48  ;;  %v703_v53 = vmul.f32 %v1673_v34, %v597_v49 }
  0xf8   :  { %v776_v51 = vadd.f32 %v1678_v36, %v705_v43  ;;  %v1326_v54 = vpack.c.bf16 %v805_v44, %v805_v44  ;;  %v1358_v55 = vpack.c.bf16 %v837_v45, %v837_v45  ;;  %v803_v56 = vmax.f32 %v739_v46, 0.0  ;;  %v472_v4 = vpop.f32.mrf.mxu0  ;;  %v600_v5 = vpop.f32.mrf.mxu1 }
  0xf9   :  { %v835_v57 = vmax.f32 %v771_v47, 0.0  ;;  %v808_v60 = vmax.f32 %v744_v50, 0.0  ;;  %v742_v62 = vadd.f32 %v1678_v36, %v671_v52  ;;  %v774_v63 = vadd.f32 %v1678_v36, %v703_v53 }
  0xfa   :  { %v840_v61 = vmax.f32 %v776_v51, 0.0  ;;  %1126 = vst.msk [vmem:[%s2068_s4 + $0x4c] sm:$0xf] %vm1106_vm1, %v1326_v54  ;;  %1158 = vst.msk [vmem:[%s2068_s4 + $0xcc] sm:$0xf] %vm1106_vm1, %v1358_v55  ;;  %v1324_v0 = vpack.c.bf16 %v803_v56, %v803_v56  ;;  %v674_v2 = vmul.f32 %v1432_v58, %v1673_v34  ;;  %v706_v3 = vmul.f32 %v1464_v59, %v1673_v34  ;;  %v1435_v14 = vpop.f32.mrf.mxu0  ;;  %v1467_v15 = vpop.f32.mrf.mxu1 }
  0xfb   :  { %v1356_v1 = vpack.c.bf16 %v835_v57, %v835_v57  ;;  %v1329_v6 = vpack.c.bf16 %v808_v60, %v808_v60  ;;  %v806_v8 = vmax.f32 %v742_v62, 0.0  ;;  %v838_v9 = vmax.f32 %v774_v63, 0.0 }
  0xfc   :  { %v1361_v7 = vpack.c.bf16 %v840_v61, %v840_v61  ;;  %1124 = vst.msk [vmem:[%s2068_s4 + $0x44] sm:$0xf] %vm1106_vm1, %v1324_v0  ;;  %v745_v10 = vadd.f32 %v1678_v36, %v674_v2  ;;  %v777_v11 = vadd.f32 %v1678_v36, %v706_v3  ;;  %v672_v12 = vmul.f32 %v1673_v34, %v472_v4  ;;  %v485_v24 = vpop.f32.mrf.mxu0  ;;  %v613_v25 = vpop.f32.mrf.mxu1 }
  0xfd   :  { %1156 = vst.msk [vmem:[%s2068_s4 + $0xc4] sm:$0xf] %vm1106_vm1, %v1356_v1  ;;  %v704_v13 = vmul.f32 %v1673_v34, %v600_v5  ;;  %1129 = vst.msk [vmem:[%s2068_s4 + $0x58] sm:$0xf] %vm1106_vm1, %v1329_v6  ;;  %v1327_v16 = vpack.c.bf16 %v806_v8, %v806_v8  ;;  %v1359_v17 = vpack.c.bf16 %v838_v9, %v838_v9 }
  0xfe   :  { %1161 = vst.msk [vmem:[%s2068_s4 + $0xd8] sm:$0xf] %vm1106_vm1, %v1361_v7  ;;  %v677_v18 = vmul.f32 %v1435_v14, %v1673_v34  ;;  %v709_v19 = vmul.f32 %v1467_v15, %v1673_v34  ;;  %v809_v20 = vmax.f32 %v745_v10, 0.0  ;;  %v841_v21 = vmax.f32 %v777_v11, 0.0  ;;  %v1436_v35 = vpop.f32.mrf.mxu0  ;;  %v1468_v37 = vpop.f32.mrf.mxu1 }
  0xff   :  { %v743_v22 = vadd.f32 %v1678_v36, %v672_v12  ;;  %v775_v23 = vadd.f32 %v1678_v36, %v704_v13  ;;  %1127 = vst.msk [vmem:[%s2068_s4 + $0x50] sm:$0xf] %vm1106_vm1, %v1327_v16  ;;  %1159 = vst.msk [vmem:[%s2068_s4 + $0xd0] sm:$0xf] %vm1106_vm1, %v1359_v17  ;;  %v675_v28 = vmul.f32 %v1673_v34, %v485_v24 }
 0x100   :  { %v748_v26 = vadd.f32 %v1678_v36, %v677_v18  ;;  %v780_v27 = vadd.f32 %v1678_v36, %v709_v19  ;;  %v707_v29 = vmul.f32 %v1673_v34, %v613_v25  ;;  %v1330_v30 = vpack.c.bf16 %v809_v20, %v809_v20  ;;  %v488_v46 = vpop.f32.mrf.mxu0  ;;  %v616_v47 = vpop.f32.mrf.mxu1 }
 0x101   :  { %v1362_v31 = vpack.c.bf16 %v841_v21, %v841_v21  ;;  %v807_v32 = vmax.f32 %v743_v22, 0.0  ;;  %v839_v33 = vmax.f32 %v775_v23, 0.0  ;;  %v746_v40 = vadd.f32 %v1678_v36, %v675_v28 }
 0x102   :  { %v812_v38 = vmax.f32 %v748_v26, 0.0  ;;  %v844_v39 = vmax.f32 %v780_v27, 0.0  ;;  %v778_v41 = vadd.f32 %v1678_v36, %v707_v29  ;;  %1130 = vst.msk [vmem:[%s2068_s4 + $0x5c] sm:$0xf] %vm1106_vm1, %v1330_v30  ;;  %v678_v44 = vmul.f32 %v1436_v35, %v1673_v34  ;;  %v1439_v56 = vpop.f32.mrf.mxu0  ;;  %v1471_v57 = vpop.f32.mrf.mxu1 }
 0x103   :  { %1162 = vst.msk [vmem:[%s2068_s4 + $0xdc] sm:$0xf] %vm1106_vm1, %v1362_v31  ;;  %v1328_v42 = vpack.c.bf16 %v807_v32, %v807_v32  ;;  %v1360_v43 = vpack.c.bf16 %v839_v33, %v839_v33  ;;  %v710_v45 = vmul.f32 %v1468_v37, %v1673_v34  ;;  %v810_v50 = vmax.f32 %v746_v40, 0.0 }
 0x104   :  { %v1333_v48 = vpack.c.bf16 %v812_v38, %v812_v38  ;;  %v1365_v49 = vpack.c.bf16 %v844_v39, %v844_v39  ;;  %v842_v51 = vmax.f32 %v778_v41, 0.0  ;;  %v749_v52 = vadd.f32 %v1678_v36, %v678_v44  ;;  %v501_v2 = vpop.f32.mrf.mxu0  ;;  %v629_v3 = vpop.f32.mrf.mxu1 }
 0x105   :  { %1128 = vst.msk [vmem:[%s2068_s4 + $0x54] sm:$0xf] %vm1106_vm1, %v1328_v42  ;;  %1160 = vst.msk [vmem:[%s2068_s4 + $0xd4] sm:$0xf] %vm1106_vm1, %v1360_v43  ;;  %v781_v53 = vadd.f32 %v1678_v36, %v710_v45  ;;  %v676_v54 = vmul.f32 %v1673_v34, %v488_v46  ;;  %v708_v55 = vmul.f32 %v1673_v34, %v616_v47 }
 0x106   :  { %1133 = vst.msk [vmem:[%s2068_s4 + $0x68] sm:$0xf] %vm1106_vm1, %v1333_v48  ;;  %1165 = vst.msk [vmem:[%s2068_s4 + $0xe8] sm:$0xf] %vm1106_vm1, %v1365_v49  ;;  %v1331_v58 = vpack.c.bf16 %v810_v50, %v810_v50  ;;  %v1363_v59 = vpack.c.bf16 %v842_v51, %v842_v51  ;;  %v681_v60 = vmul.f32 %v1439_v56, %v1673_v34  ;;  %v813_v62 = vmax.f32 %v749_v52, 0.0  ;;  %v1440_v12 = vpop.f32.mrf.mxu0  ;;  %v1472_v13 = vpop.f32.mrf.mxu1 }
 0x107   :  { %v713_v61 = vmul.f32 %v1471_v57, %v1673_v34  ;;  %v845_v63 = vmax.f32 %v781_v53, 0.0  ;;  %v747_v0 = vadd.f32 %v1678_v36, %v676_v54  ;;  %v779_v1 = vadd.f32 %v1678_v36, %v708_v55 }
 0x108   :  { %1131 = vst.msk [vmem:[%s2068_s4 + $0x60] sm:$0xf] %vm1106_vm1, %v1331_v58  ;;  %1163 = vst.msk [vmem:[%s2068_s4 + $0xe0] sm:$0xf] %vm1106_vm1, %v1363_v59  ;;  %v752_v4 = vadd.f32 %v1678_v36, %v681_v60  ;;  %v679_v6 = vmul.f32 %v1673_v34, %v501_v2  ;;  %v711_v7 = vmul.f32 %v1673_v34, %v629_v3  ;;  %v504_v22 = vpop.f32.mrf.mxu0  ;;  %v632_v23 = vpop.f32.mrf.mxu1 }
 0x109   :  { %v784_v5 = vadd.f32 %v1678_v36, %v713_v61  ;;  %v1334_v8 = vpack.c.bf16 %v813_v62, %v813_v62  ;;  %v1366_v9 = vpack.c.bf16 %v845_v63, %v845_v63  ;;  %v811_v10 = vmax.f32 %v747_v0, 0.0 }
 0x10a   :  { %v843_v11 = vmax.f32 %v779_v1, 0.0  ;;  %v816_v14 = vmax.f32 %v752_v4, 0.0  ;;  %v750_v16 = vadd.f32 %v1678_v36, %v679_v6  ;;  %v782_v17 = vadd.f32 %v1678_v36, %v711_v7 }
 0x10b   :  { %v848_v15 = vmax.f32 %v784_v5, 0.0  ;;  %1134 = vst.msk [vmem:[%s2068_s4 + $0x6c] sm:$0xf] %vm1106_vm1, %v1334_v8  ;;  %1166 = vst.msk [vmem:[%s2068_s4 + $0xec] sm:$0xf] %vm1106_vm1, %v1366_v9  ;;  %v1332_v18 = vpack.c.bf16 %v811_v10, %v811_v10  ;;  %v682_v20 = vmul.f32 %v1440_v12, %v1673_v34  ;;  %v714_v21 = vmul.f32 %v1472_v13, %v1673_v34 }
 0x10c   :  { %v1364_v19 = vpack.c.bf16 %v843_v11, %v843_v11  ;;  %v1337_v24 = vpack.c.bf16 %v816_v14, %v816_v14  ;;  %v814_v26 = vmax.f32 %v750_v16, 0.0  ;;  %v846_v27 = vmax.f32 %v782_v17, 0.0 }
 0x10d   :  { %v1369_v25 = vpack.c.bf16 %v848_v15, %v848_v15  ;;  %1132 = vst.msk [vmem:[%s2068_s4 + $0x64] sm:$0xf] %vm1106_vm1, %v1332_v18  ;;  %v753_v28 = vadd.f32 %v1678_v36, %v682_v20  ;;  %v785_v29 = vadd.f32 %v1678_v36, %v714_v21  ;;  %v680_v30 = vmul.f32 %v1673_v34, %v504_v22 }
 0x10e   :  { %1164 = vst.msk [vmem:[%s2068_s4 + $0xe4] sm:$0xf] %vm1106_vm1, %v1364_v19  ;;  %v712_v31 = vmul.f32 %v1673_v34, %v632_v23  ;;  %1137 = vst.msk [vmem:[%s2068_s4 + $0x78] sm:$0xf] %vm1106_vm1, %v1337_v24  ;;  %v1335_v32 = vpack.c.bf16 %v814_v26, %v814_v26  ;;  %v1367_v33 = vpack.c.bf16 %v846_v27, %v846_v27 }
 0x10f   :  { %1169 = vst.msk [vmem:[%s2068_s4 + $0xf8] sm:$0xf] %vm1106_vm1, %v1369_v25  ;;  %v817_v35 = vmax.f32 %v753_v28, 0.0  ;;  %v849_v37 = vmax.f32 %v785_v29, 0.0  ;;  %v751_v38 = vadd.f32 %v1678_v36, %v680_v30 }
 0x110   :  { %v783_v39 = vadd.f32 %v1678_v36, %v712_v31  ;;  %1135 = vst.msk [vmem:[%s2068_s4 + $0x70] sm:$0xf] %vm1106_vm1, %v1335_v32  ;;  %1167 = vst.msk [vmem:[%s2068_s4 + $0xf0] sm:$0xf] %vm1106_vm1, %v1367_v33 }
 0x111   :  { %v1338_v34 = vpack.c.bf16 %v817_v35, %v817_v35  ;;  %v1370_v40 = vpack.c.bf16 %v849_v37, %v849_v37  ;;  %v815_v41 = vmax.f32 %v751_v38, 0.0 }
 0x112   :  { %v847_v42 = vmax.f32 %v783_v39, 0.0 }
 0x113   :  { %1138 = vst.msk [vmem:[%s2068_s4 + $0x7c] sm:$0xf] %vm1106_vm1, %v1338_v34  ;;  %1170 = vst.msk [vmem:[%s2068_s4 + $0xfc] sm:$0xf] %vm1106_vm1, %v1370_v40  ;;  %v1336_v36 = vpack.c.bf16 %v815_v41, %v815_v41 }
 0x114   :  { %v1368_v43 = vpack.c.bf16 %v847_v42, %v847_v42 }
 0x115   :  { %1136 = vst.msk [vmem:[%s2068_s4 + $0x74] sm:$0xf] %vm1106_vm1, %v1336_v36 }
 0x116   :  { %1168 = vst.msk [vmem:[%s2068_s4 + $0xf4] sm:$0xf] %vm1106_vm1, %v1368_v43 }

</bundles_post_ra>
